<compile_context>
chip_gen: v5e
topology: v5e:2x2
jax: 0.10.0
libtpu: 0.0.40
codegen_flags: <defaults>
</compile_context>

<pallas_src>
import functools
from typing import NamedTuple

import numpy as np
import jax
import jax.numpy as jnp
from jax.experimental import pallas as pl
from jax.experimental.pallas import tpu as pltpu


def _round_up(v, m):
    return (v + m - 1) // m * m


def _vmem_capacity_bytes():
    try:
        info = pltpu.get_tpu_info()
        cap = getattr(info, "vmem_capacity_bytes", None)
        if cap:
            return int(cap)
    except Exception:
        pass
    return 64 * 1024 * 1024  # conservative default (v7x per-TensorCore VMEM)


# --------------------------------------------------------------------------- #
# Kernel
# --------------------------------------------------------------------------- #
def support_encoder_kernel(x_ref, w1_ref, b1_ref, w2_ref, b2_ref,
                           gamma_ref, beta_ref, o_ref, acc_ref,
                           *, eps, d_valid, n_pad):
    k = pl.program_id(1)

    # k == 0: start the accumulator at residual + proj2 bias (fused for free).
    @pl.when(k == 0)
    def _init():
        acc_ref[...] = x_ref[...] + b2_ref[...]

    # One d_inner chunk:  h_k = relu(x @ W1[:, k] + b1[k]);  acc += h_k @ W2[k]
    # bf16 MXU inputs, f32 accumulation; ReLU is elementwise so chunking over
    # d_inner is exact.
    h = jnp.dot(x_ref[...].astype(jnp.bfloat16), w1_ref[...],
                preferred_element_type=jnp.float32)
    h = jnp.maximum(h + b1_ref[...], 0.0)                  # (rt, ik) f32
    acc_ref[...] += jnp.dot(h.astype(jnp.bfloat16), w2_ref[...],
                            preferred_element_type=jnp.float32)

    # Last chunk: LayerNorm epilogue + store (output block is resident over k).
    @pl.when(k == pl.num_programs(1) - 1)
    def _finalize():
        z = acc_ref[...]                                   # (rt, Dp) f32
        # Padded lanes of z are exactly 0 (zero-padded x/W2/b2), so the plain
        # row sum equals the sum over the valid d_model lanes.
        mu = jnp.sum(z, axis=-1, keepdims=True) * (1.0 / d_valid)
        diff = z - mu
        ss = jnp.sum(diff * diff, axis=-1, keepdims=True)
        if n_pad:  # static: each zero-padded lane contributes exactly mu^2
            ss = jnp.maximum(ss - float(n_pad) * (mu * mu), 0.0)
        # torch.std default is unbiased: divide by (n - 1).
        sigma = jnp.sqrt(ss * (1.0 / (d_valid - 1)))
        inv = pl.reciprocal(sigma + eps, approx=True)      # EUP, frees VALU slots
        # gamma / beta are zero in padded lanes, so padded output lanes stay 0.
        y = diff * inv * gamma_ref[...] + beta_ref[...]
        o_ref[...] = y.astype(o_ref.dtype)


# --------------------------------------------------------------------------- #
# Parameter preparation (do ONCE, hoisted out of the per-call path)
# --------------------------------------------------------------------------- #
class SupportEncoderParams(NamedTuple):
    w1: jax.Array      # (Dp, Kp) bf16
    b1: jax.Array      # (1, Kp)  f32
    w2: jax.Array      # (Kp, Dp) bf16
    b2: jax.Array      # (1, Dp)  f32
    gamma: jax.Array   # (1, Dp)  f32
    beta: jax.Array    # (1, Dp)  f32
    d_model: int
    d_inner: int
    ik: int            # d_inner chunk size (grid K tile)


def prepare_support_encoder_params(w1, b1, w2, b2, gamma, beta, *, inner_tile=512):
    """w1: (d_model, d_inner), w2: (d_inner, d_model) — already transposed for x @ W."""
    d_model, d_inner = w1.shape
    assert w2.shape == (d_inner, d_model)

    Dp = _round_up(d_model, 128)                      # lane-dense feature dim
    inner_tile = _round_up(inner_tile, 128)
    ik = min(inner_tile, _round_up(d_inner, 128))     # d_inner chunk (multiple of 128)
    Kp = _round_up(d_inner, ik)                       # padded inner dim

    w1_p = jnp.zeros((Dp, Kp), jnp.bfloat16).at[:d_model, :d_inner].set(
        w1.astype(jnp.bfloat16))
    w2_p = jnp.zeros((Kp, Dp), jnp.bfloat16).at[:d_inner, :d_model].set(
        w2.astype(jnp.bfloat16))
    b1_p = jnp.zeros((1, Kp), jnp.float32).at[:, :d_inner].set(
        b1.reshape(1, -1).astype(jnp.float32))
    b2_p = jnp.zeros((1, Dp), jnp.float32).at[:, :d_model].set(
        b2.reshape(1, -1).astype(jnp.float32))
    g_p = jnp.zeros((1, Dp), jnp.float32).at[:, :d_model].set(
        gamma.reshape(1, -1).astype(jnp.float32))
    be_p = jnp.zeros((1, Dp), jnp.float32).at[:, :d_model].set(
        beta.reshape(1, -1).astype(jnp.float32))

    return SupportEncoderParams(w1_p, b1_p, w2_p, b2_p, g_p, be_p,
                                d_model, d_inner, ik)


# --------------------------------------------------------------------------- #
# Apply
# --------------------------------------------------------------------------- #
def support_encoder_apply(x, params, *, eps=0.001, row_tile=None, out_dtype=None):
    """x: (N, d_model) f32. Returns (N, d_model) in out_dtype (default x.dtype)."""
    N, d_model = x.shape
    assert d_model == params.d_model
    # TODO(synk): LayerNormalization returns z unchanged when d_hid == 1; that edge
    # case (d_model == 1) is not handled here.
    assert d_model >= 2, "d_model == 1 (LN identity shortcut) not supported"

    Dp, Kp = params.w1.shape
    ik = params.ik
    n_k = Kp // ik
    out_dtype = out_dtype or x.dtype
    out_itemsize = np.dtype(out_dtype).itemsize

    # ---- per-generation VMEM budget ---------------------------------------
    cap = _vmem_capacity_bytes()          # 64 MiB v7x / 128 MiB v5e-v6e (per core)
    budget = int(0.80 * cap)

    if row_tile is None:
        row_tile = 1024 if cap >= 96 * 1024 * 1024 else 512

    # ---- row tile: 16-aligned (bf16 sublane packing), 256-aligned when large,
    #      and >= 2 tiles when N allows (v7x dual TensorCore) -----------------
    rt = _round_up(min(row_tile, _round_up(N, 16)), 16)
    if N >= 512 and rt >= 256:
        rt = _round_up(rt, 256)
    if N >= 32 and _round_up(N, rt) // rt < 2:
        rt = max(16, _round_up((N + 1) // 2, 16))

    def working_set(rt_):
        return (2 * rt_ * Dp * 4                      # x double-buffer (f32)
                + 2 * rt_ * Dp * out_itemsize         # out double-buffer
                + rt_ * Dp * 4                        # accumulator scratch
                + 2 * Dp * ik * 2 + 2 * ik * Dp * 2   # W1 / W2 chunk buffers (bf16)
                + rt_ * ik * 6                        # h (f32) + bf16 copy
                + 2 * (ik + 3 * Dp) * 4)              # biases / gamma / beta

    while working_set(rt) > budget and rt > 16:
        rt = max(16, _round_up(rt // 2, 16))

    Np = _round_up(N, rt)
    need = working_set(rt)
    vmem_limit = min(int(0.85 * cap), max(2 * need + (16 << 20), 64 << 20))

    # ---- pad x only when necessary (statically skipped when aligned) -------
    if (Np, Dp) == (N, d_model):
        x_p = x.astype(jnp.float32)
        needs_slice = False
    else:
        x_p = jnp.zeros((Np, Dp), jnp.float32).at[:N, :d_model].set(
            x.astype(jnp.float32))
        needs_slice = True

    kern = functools.partial(support_encoder_kernel, eps=eps,
                             d_valid=d_model, n_pad=Dp - d_model)

    cost = pl.CostEstimate(
        flops=int(4 * Np * Dp * Kp + 10 * Np * Dp),
        transcendentals=int(2 * Np),
        bytes_accessed=int(Np * Dp * 4 + Np * Dp * out_itemsize
                           + (Np // rt) * (2 * Dp * Kp * 2)
                           + Kp * 4 + 3 * Dp * 4),
    )

    out_p = pl.pallas_call(
        kern,
        out_shape=jax.ShapeDtypeStruct((Np, Dp), out_dtype),
        grid_spec=pltpu.PrefetchScalarGridSpec(
            num_scalar_prefetch=0,
            grid=(Np // rt, n_k),                          # (rows, d_inner chunks)
            in_specs=[
                pl.BlockSpec((rt, Dp), lambda i, k: (i, 0)),   # x tile (const in k)
                pl.BlockSpec((Dp, ik), lambda i, k: (0, k)),   # W1 chunk (bf16)
                pl.BlockSpec((1, ik), lambda i, k: (0, k)),    # b1 chunk
                pl.BlockSpec((ik, Dp), lambda i, k: (k, 0)),   # W2 chunk (bf16)
                pl.BlockSpec((1, Dp), lambda i, k: (0, 0)),    # b2   (resident)
                pl.BlockSpec((1, Dp), lambda i, k: (0, 0)),    # gamma (a_2)
                pl.BlockSpec((1, Dp), lambda i, k: (0, 0)),    # beta  (b_2)
            ],
            out_specs=pl.BlockSpec((rt, Dp), lambda i, k: (i, 0)),
            scratch_shapes=[pltpu.VMEM((rt, Dp), jnp.float32)],   # f32 accumulator
        ),
        compiler_params=pltpu.CompilerParams(
            dimension_semantics=("parallel", "arbitrary"),
            vmem_limit_bytes=vmem_limit,
        ),
        cost_estimate=cost,
    )(x_p, params.w1, params.b1, params.w2, params.b2, params.gamma, params.beta)

    if needs_slice:
        return out_p[:N, :d_model]
    return out_p


def support_encoder(x, w1, b1, w2, b2, gamma, beta, *, eps=0.001,
                    row_tile=None, inner_tile=512, out_dtype=None):
    """Convenience wrapper: prepare (pad + cast) params, then apply.

    In a real model call prepare_support_encoder_params() once at init and
    reuse the result across calls (hoists all padding/casting off the hot path).
    """
    params = prepare_support_encoder_params(w1, b1, w2, b2, gamma, beta,
                                            inner_tile=inner_tile)
    return support_encoder_apply(x, params, eps=eps, row_tile=row_tile,
                                 out_dtype=out_dtype)


# --------------------------------------------------------------------------- #
# Reference + test
# --------------------------------------------------------------------------- #
def xavier_normal(key, fan_out, fan_in):
    # torch.nn.init.xavier_normal_ on a (fan_out, fan_in) Linear weight.
    std = (2.0 / (fan_in + fan_out)) ** 0.5
    return std * jax.random.normal(key, (fan_out, fan_in), dtype=jnp.float32)


def reference_jax(x, w1, b1, w2, b2, gamma, beta, eps=0.001):
    # Mirror the kernel's bf16 MXU inputs (f32 accumulation) for a tight comparison.
    xb = x.astype(jnp.bfloat16).astype(jnp.float32)
    w1b = w1.astype(jnp.bfloat16).astype(jnp.float32)
    w2b = w2.astype(jnp.bfloat16).astype(jnp.float32)
    h = jnp.maximum(xb @ w1b + b1.reshape(1, -1), 0.0)
    out = h.astype(jnp.bfloat16).astype(jnp.float32) @ w2b + b2.reshape(1, -1)
    z = out + x
    mu = jnp.mean(z, axis=-1, keepdims=True)
    d = z.shape[-1]
    sigma = jnp.sqrt(jnp.sum((z - mu) ** 2, axis=-1, keepdims=True) / (d - 1))
    return (z - mu) / (sigma + eps) * gamma.reshape(1, -1) + beta.reshape(1, -1)


if __name__ == "__main__":
    def run_case(key, N, d_model, d_inner):
        k_x, k_w1, k_w2, k_b1, k_b2, k_g, k_be = jax.random.split(key, 7)
        x = jax.random.normal(k_x, (N, d_model), dtype=jnp.float32)
        # proj1: torch Linear(d_model, d_inner) weight (d_inner, d_model), xavier_normal.
        w1 = xavier_normal(k_w1, d_inner, d_model).T      # (d_model, d_inner)
        w2 = xavier_normal(k_w2, d_model, d_inner).T      # (d_inner, d_model)
        b1 = 0.01 * jax.random.normal(k_b1, (d_inner,), dtype=jnp.float32)
        b2 = 0.01 * jax.random.normal(k_b2, (d_model,), dtype=jnp.float32)
        # a_2 / b_2 initialize to ones/zeros in the module; perturb slightly so the
        # scale/shift path is actually exercised.
        gamma = 1.0 + 0.1 * jax.random.normal(k_g, (d_model,), dtype=jnp.float32)
        beta = 0.05 * jax.random.normal(k_be, (d_model,), dtype=jnp.float32)

        y = support_encoder(x, w1, b1, w2, b2, gamma, beta)
        y = jax.block_until_ready(y)
        y_ref = reference_jax(x, w1, b1, w2, b2, gamma, beta)

        assert y.shape == (N, d_model)
        # bf16 matmul inputs + approx reciprocal -> modest tolerance vs. reference.
        assert jnp.allclose(y, y_ref, atol=5e-3, rtol=5e-3), \
            f"mismatch vs reference (N={N}, d_model={d_model}, d_inner={d_inner})"

    root = jax.random.PRNGKey(0)
    k1, k2 = jax.random.split(root)
    run_case(k1, N=8, d_model=32, d_inner=64)      # lane-padded (masked-free LN correction)
    run_case(k2, N=40, d_model=128, d_inner=256)   # lane-aligned path, 2 row tiles

    print("KERNEL_OK")
</pallas_src>

<mosaic_0001>
module attributes {stable_mosaic.version = 11 : i64} {
  func.func @support_encoder_kernel(%arg0: i32, %arg1: i32, %arg2: memref<16x128xf32, #tpu.memory_space<vmem>>, %arg3: memref<128x128xbf16, #tpu.memory_space<vmem>>, %arg4: memref<1x128xf32, #tpu.memory_space<vmem>>, %arg5: memref<128x128xbf16, #tpu.memory_space<vmem>>, %arg6: memref<1x128xf32, #tpu.memory_space<vmem>>, %arg7: memref<1x128xf32, #tpu.memory_space<vmem>>, %arg8: memref<1x128xf32, #tpu.memory_space<vmem>>, %arg9: memref<16x128xf32, #tpu.memory_space<vmem>>, %arg10: memref<16x128xf32, #tpu.memory_space<vmem>>) attributes {dimension_semantics = [#tpu.dimension_semantics<parallel>, #tpu.dimension_semantics<arbitrary>], iteration_bounds = array<i64: 1, 1>, scalar_prefetch = 0 : i64, scratch_operands = 1 : i64, tpu.core_type = #tpu.core_type<tc>, window_params = [{transform_indices = @transform_0, window_bounds = array<i64: 16, 128>}, {transform_indices = @transform_1, window_bounds = array<i64: 128, 128>}, {transform_indices = @transform_2, window_bounds = array<i64: 1, 128>}, {transform_indices = @transform_3, window_bounds = array<i64: 128, 128>}, {pipeline_mode = #tpu.pipeline_mode<synchronous>, transform_indices = @transform_4, window_bounds = array<i64: 1, 128>}, {pipeline_mode = #tpu.pipeline_mode<synchronous>, transform_indices = @transform_5, window_bounds = array<i64: 1, 128>}, {pipeline_mode = #tpu.pipeline_mode<synchronous>, transform_indices = @transform_6, window_bounds = array<i64: 1, 128>}, {transform_indices = @transform_7, window_bounds = array<i64: 16, 128>}]} {
    %c0_i32 = arith.constant 0 : i32
    %0 = arith.cmpi eq, %arg1, %c0_i32 : i32
    %1 = arith.extui %0 : i1 to i32
    %c0_i32_0 = arith.constant 0 : i32
    %2 = arith.cmpi ne, %1, %c0_i32_0 : i32
    scf.if %2 {
      %c0_16 = arith.constant 0 : index
      %c0_17 = arith.constant 0 : index
      %21 = vector.load %arg2[%c0_16, %c0_17] : memref<16x128xf32, #tpu.memory_space<vmem>>, vector<16x128xf32>
      %c0_18 = arith.constant 0 : index
      %c0_19 = arith.constant 0 : index
      %22 = vector.load %arg6[%c0_18, %c0_19] : memref<1x128xf32, #tpu.memory_space<vmem>>, vector<1x128xf32>
      %23 = vector.broadcast %22 : vector<1x128xf32> to vector<16x128xf32>
      %24 = arith.addf %21, %23 : vector<16x128xf32>
      %c0_20 = arith.constant 0 : index
      %c0_21 = arith.constant 0 : index
      %25 = vector.load %arg10[%c0_20, %c0_21] : memref<16x128xf32, #tpu.memory_space<vmem>>, vector<16x128xf32>
      tpu.vector_store %arg10[%c0_20, %c0_21], %24 {strides = array<i32>} : memref<16x128xf32, #tpu.memory_space<vmem>>, vector<16x128xf32>,
    } else {
    }
    %c0 = arith.constant 0 : index
    %c0_1 = arith.constant 0 : index
    %3 = vector.load %arg2[%c0, %c0_1] : memref<16x128xf32, #tpu.memory_space<vmem>>, vector<16x128xf32>
    %4 = arith.truncf %3 : vector<16x128xf32> to vector<16x128xbf16>
    %c0_2 = arith.constant 0 : index
    %c0_3 = arith.constant 0 : index
    %5 = vector.load %arg3[%c0_2, %c0_3] : memref<128x128xbf16, #tpu.memory_space<vmem>>, vector<128x128xbf16>
    %cst = arith.constant dense<0.000000e+00> : vector<16x128xf32>
    %6 = tpu.matmul %4, %5, %cst {dimension_numbers = #tpu.dot_dimension_numbers<[1], [0], [0], [1], [0, 0, 1, 1], [], []>} : vector<16x128xbf16>, vector<128x128xbf16>, vector<16x128xf32> -> vector<16x128xf32>
    %c0_4 = arith.constant 0 : index
    %c0_5 = arith.constant 0 : index
    %7 = vector.load %arg4[%c0_4, %c0_5] : memref<1x128xf32, #tpu.memory_space<vmem>>, vector<1x128xf32>
    %8 = vector.broadcast %7 : vector<1x128xf32> to vector<16x128xf32>
    %9 = arith.addf %6, %8 : vector<16x128xf32>
    %cst_6 = arith.constant 0.000000e+00 : f32
    %10 = vector.broadcast %cst_6 : f32 to vector<16x128xf32>
    %11 = arith.maximumf %9, %10 : vector<16x128xf32>
    %c0_7 = arith.constant 0 : index
    %c0_8 = arith.constant 0 : index
    %12 = vector.load %arg10[%c0_7, %c0_8] : memref<16x128xf32, #tpu.memory_space<vmem>>, vector<16x128xf32>
    %13 = arith.truncf %11 : vector<16x128xf32> to vector<16x128xbf16>
    %c0_9 = arith.constant 0 : index
    %c0_10 = arith.constant 0 : index
    %14 = vector.load %arg5[%c0_9, %c0_10] : memref<128x128xbf16, #tpu.memory_space<vmem>>, vector<128x128xbf16>
    %cst_11 = arith.constant dense<0.000000e+00> : vector<16x128xf32>
    %15 = tpu.matmul %13, %14, %cst_11 {dimension_numbers = #tpu.dot_dimension_numbers<[1], [0], [0], [1], [0, 0, 1, 1], [], []>} : vector<16x128xbf16>, vector<128x128xbf16>, vector<16x128xf32> -> vector<16x128xf32>
    %16 = arith.addf %12, %15 : vector<16x128xf32>
    %c0_12 = arith.constant 0 : index
    %c0_13 = arith.constant 0 : index
    %17 = vector.load %arg10[%c0_12, %c0_13] : memref<16x128xf32, #tpu.memory_space<vmem>>, vector<16x128xf32>
    tpu.vector_store %arg10[%c0_12, %c0_13], %16 {strides = array<i32>} : memref<16x128xf32, #tpu.memory_space<vmem>>, vector<16x128xf32>,
    %c0_i32_14 = arith.constant 0 : i32
    %18 = arith.cmpi eq, %arg1, %c0_i32_14 : i32
    %19 = arith.extui %18 : i1 to i32
    %c0_i32_15 = arith.constant 0 : i32
    %20 = arith.cmpi ne, %19, %c0_i32_15 : i32
    scf.if %20 {
      %c0_16 = arith.constant 0 : index
      %c0_17 = arith.constant 0 : index
      %21 = vector.load %arg10[%c0_16, %c0_17] : memref<16x128xf32, #tpu.memory_space<vmem>>, vector<16x128xf32>
      %cst_18 = arith.constant dense<0.000000e+00> : vector<16xf32>
      %22 = vector.multi_reduction <add>, %21, %cst_18 [1] : vector<16x128xf32> to vector<16xf32>
      %23 = vector.shape_cast %22 : vector<16xf32> to vector<16x1xf32>
      %cst_19 = arith.constant 3.125000e-02 : f32
      %24 = vector.broadcast %cst_19 : f32 to vector<16x1xf32>
      %25 = arith.mulf %23, %24 : vector<16x1xf32>
      %26 = vector.broadcast %25 : vector<16x1xf32> to vector<16x128xf32>
      %27 = arith.subf %21, %26 : vector<16x128xf32>
      %28 = arith.mulf %27, %27 : vector<16x128xf32>
      %cst_20 = arith.constant dense<0.000000e+00> : vector<16xf32>
      %29 = vector.multi_reduction <add>, %28, %cst_20 [1] : vector<16x128xf32> to vector<16xf32>
      %30 = vector.shape_cast %29 : vector<16xf32> to vector<16x1xf32>
      %31 = arith.mulf %25, %25 : vector<16x1xf32>
      %cst_21 = arith.constant 9.600000e+01 : f32
      %32 = vector.broadcast %cst_21 : f32 to vector<16x1xf32>
      %33 = arith.mulf %32, %31 : vector<16x1xf32>
      %34 = arith.subf %30, %33 : vector<16x1xf32>
      %cst_22 = arith.constant 0.000000e+00 : f32
      %35 = vector.broadcast %cst_22 : f32 to vector<16x1xf32>
      %36 = arith.maximumf %34, %35 : vector<16x1xf32>
      %cst_23 = arith.constant 0.0322580636 : f32
      %37 = vector.broadcast %cst_23 : f32 to vector<16x1xf32>
      %38 = arith.mulf %36, %37 : vector<16x1xf32>
      %39 = math.sqrt %38 : vector<16x1xf32>
      %cst_24 = arith.constant 1.000000e-03 : f32
      %40 = vector.broadcast %cst_24 : f32 to vector<16x1xf32>
      %41 = arith.addf %39, %40 : vector<16x1xf32>
      %42 = tpu.reciprocal %41 {approx = true} : vector<16x1xf32> -> vector<16x1xf32>
      %43 = vector.broadcast %42 : vector<16x1xf32> to vector<16x128xf32>
      %44 = arith.mulf %27, %43 : vector<16x128xf32>
      %c0_25 = arith.constant 0 : index
      %c0_26 = arith.constant 0 : index
      %45 = vector.load %arg7[%c0_25, %c0_26] : memref<1x128xf32, #tpu.memory_space<vmem>>, vector<1x128xf32>
      %46 = vector.broadcast %45 : vector<1x128xf32> to vector<16x128xf32>
      %47 = arith.mulf %44, %46 : vector<16x128xf32>
      %c0_27 = arith.constant 0 : index
      %c0_28 = arith.constant 0 : index
      %48 = vector.load %arg8[%c0_27, %c0_28] : memref<1x128xf32, #tpu.memory_space<vmem>>, vector<1x128xf32>
      %49 = vector.broadcast %48 : vector<1x128xf32> to vector<16x128xf32>
      %50 = arith.addf %47, %49 : vector<16x128xf32>
      %c0_29 = arith.constant 0 : index
      %c0_30 = arith.constant 0 : index
      %51 = vector.load %arg9[%c0_29, %c0_30] : memref<16x128xf32, #tpu.memory_space<vmem>>, vector<16x128xf32>
      tpu.vector_store %arg9[%c0_29, %c0_30], %50 {strides = array<i32>} : memref<16x128xf32, #tpu.memory_space<vmem>>, vector<16x128xf32>,
    } else {
    }
    return
  }
  func.func @transform_0(%arg0: i32, %arg1: i32) -> (i32, i32) {
    %c0_i32 = arith.constant 0 : i32
    %c0_i32_0 = arith.constant 0 : i32
    return %arg0, %c0_i32 : i32, i32
  }
  func.func @transform_1(%arg0: i32, %arg1: i32) -> (i32, i32) {
    %c0_i32 = arith.constant 0 : i32
    %c0_i32_0 = arith.constant 0 : i32
    return %c0_i32, %arg1 : i32, i32
  }
  func.func @transform_2(%arg0: i32, %arg1: i32) -> (i32, i32) {
    %c0_i32 = arith.constant 0 : i32
    %c0_i32_0 = arith.constant 0 : i32
    return %c0_i32, %arg1 : i32, i32
  }
  func.func @transform_3(%arg0: i32, %arg1: i32) -> (i32, i32) {
    %c0_i32 = arith.constant 0 : i32
    %c0_i32_0 = arith.constant 0 : i32
    return %arg1, %c0_i32 : i32, i32
  }
  func.func @transform_4(%arg0: i32, %arg1: i32) -> (i32, i32) {
    %c0_i32 = arith.constant 0 : i32
    %c0_i32_0 = arith.constant 0 : i32
    %c0_i32_1 = arith.constant 0 : i32
    return %c0_i32, %c0_i32_0 : i32, i32
  }
  func.func @transform_5(%arg0: i32, %arg1: i32) -> (i32, i32) {
    %c0_i32 = arith.constant 0 : i32
    %c0_i32_0 = arith.constant 0 : i32
    %c0_i32_1 = arith.constant 0 : i32
    return %c0_i32, %c0_i32_0 : i32, i32
  }
  func.func @transform_6(%arg0: i32, %arg1: i32) -> (i32, i32) {
    %c0_i32 = arith.constant 0 : i32
    %c0_i32_0 = arith.constant 0 : i32
    %c0_i32_1 = arith.constant 0 : i32
    return %c0_i32, %c0_i32_0 : i32, i32
  }
  func.func @transform_7(%arg0: i32, %arg1: i32) -> (i32, i32) {
    %c0_i32 = arith.constant 0 : i32
    %c0_i32_0 = arith.constant 0 : i32
    return %arg0, %c0_i32 : i32, i32
  }
}

</mosaic_0001>

<bundles_post_ra>
// kernel: tpu_custom_call.1
= control target key start
LH: loop header
LB: loop body
LE: loop exit
PB: predicated region body
PF: predicated region fallthrough
CT: control target
= control target key end

     0   :  { %12 = vsyncpa [#allocation4], 0  ;;  %s633_s0 = inlined_call_operand.hbm [shape: f32[16,128], index: 0, kind: input, shape index: {}]   ;;  %s634_s1 = inlined_call_operand.hbm [shape: bf16[128,128], index: 1, kind: input, shape index: {}]   ;;  %s635_s2 = inlined_call_operand.vmem [shape: f32[1,128], index: 2, kind: input, shape index: {}]   ;;  %s636_s3 = inlined_call_operand.hbm [shape: bf16[128,128], index: 3, kind: input, shape index: {}]   ;;  %s637_s4 = inlined_call_operand.vmem [shape: f32[1,128], index: 4, kind: input, shape index: {}]   ;;  %s638_s5 = inlined_call_operand.vmem [shape: f32[1,128], index: 5, kind: input, shape index: {}]   ;;  %s639_s6 = inlined_call_operand.vmem [shape: f32[1,128], index: 6, kind: input, shape index: {}]   ;;  %s640_s7 = inlined_call_operand.hbm [shape: f32[16,128], index: 7, kind: output, shape index: {}]  }
   0x1   :  { %13 = vsyncpa [#allocation7], 0  ;;  %s32_s26 = sshll.u32 %s634_s1, 4  ;;  %s33_s26 = int_to_ptr.hbm [resolvable:$true] %s32_s26 }
   0x2   :  { %14 = vsyncpa [#allocation5], 0  ;;  %s555_s27 = smov [#allocation6]   ;;  %s19_s8 = sshll.u32 %s633_s0, 4  ;;  %s20_s8 = int_to_ptr.hbm [resolvable:$true] %s19_s8 }
   0x3   :  { %s34_s28 = sshll.u32 %s555_s27, 4  ;;  %s556_s9 = smov 64   ;;  %s35_s28 = int_to_ptr.vmem [resolvable:$true] %s34_s28 }
   0x4   :  { %s557_s10 = smov 4   ;;  %s558_s11 = smov [#allocation3]  }
   0x5   :  { %40 = dma.hbm_to_vmem [thread:$0]  %s33_s26, 1024, %s35_s28, [#allocation7], %s556_s9, %s556_s9, %s557_s10  }
   0x6   :  { %s21_s12 = sshll.u32 %s558_s11, 4  ;;  %s559_s13 = smov 128   ;;  %s22_s12 = int_to_ptr.vmem [resolvable:$true] %s21_s12 }
   0x7   :  { %s560_s14 = smov 8   ;;  %s47_s16 = sshll.u32 %s636_s3, 4  ;;  %s48_s16 = int_to_ptr.hbm [resolvable:$true] %s47_s16 }
   0x8   :  { %27 = dma.hbm_to_vmem [thread:$0]  %s20_s8, 256, %s22_s12, [#allocation4], %s559_s13, %s559_s13, %s560_s14  }
   0x9   :  { %s561_s17 = smov [#allocation8]  }
   0xa   :  { %s49_s0 = sshll.u32 %s561_s17, 4  ;;  %s50_s0 = int_to_ptr.vmem [resolvable:$true] %s49_s0 }
   0xb   :  { %55 = dma.hbm_to_vmem [thread:$0]  %s48_s16, 1024, %s50_s0, [#allocation7], %s556_s9, %s556_s9, %s557_s10  }
   0xc   :  { %549 = dma.done.wait [#allocation4], 256  }
   0xd   :  { %550 = vsyncadd [#allocation4], 4294967040 }
   0xe   :  { %551 = dma.done.wait [#allocation7], 2048  }
   0xf   :  { %552 = vsyncadd [#allocation7], 4294965248  ;;  %v424_v0 = vld [vmem:[#allocation6 + $0x38] sm:$0xff]  ;;  %v423_v1 = vld [vmem:[#allocation6 + $0x30] sm:$0xff]  ;;  %s562_s23 = smov [#allocation9]   ;;  %s339_s27 = sshll.u32 %s640_s7, 4  ;;  %s340_s27 = int_to_ptr.hbm [resolvable:$true] %s339_s27 }
  0x10   :  { %159 = vmatpush.bf16.msra.mxu0 %v424_v0  ;;  %v432_v2 = vld [vmem:[#allocation8 + $0x38] sm:$0xff]  ;;  %v431_v3 = vld [vmem:[#allocation8 + $0x30] sm:$0xff]  ;;  %v422_v4 = vld [vmem:[#allocation6 + $0x28] sm:$0xff]  ;;  %s337_s24 = sshll.u32 %s562_s23, 4  ;;  %s338_s24 = int_to_ptr.vmem [resolvable:$true] %s337_s24 }
  0x11   :  { %242 = vmatpush.bf16.msra.mxu1 %v432_v2  ;;  %v430_v5 = vld [vmem:[#allocation8 + $0x28] sm:$0xff]  ;;  %v421_v6 = vld [vmem:[#allocation6 + $0x20] sm:$0xff]  ;;  %v420_v8 = vld [vmem:[#allocation6 + $0x18] sm:$0xff] }
  0x12   :  { %v429_v7 = vld [vmem:[#allocation8 + $0x20] sm:$0xff]  ;;  %v419_v9 = vld [vmem:[#allocation6 + $0x10] sm:$0xff]  ;;  %v418_v10 = vld [vmem:[#allocation6 + $0x8] sm:$0xff] }
  0x13   :  { %v417_v11 = vld [vmem:[#allocation6] sm:$0xff]  ;;  %v88_v12 = vld [vmem:[#allocation3] sm:$0xff]  ;;  %v89_v13 = vld [vmem:[#allocation3 + $0x8] sm:$0xff] }
  0x14   :  { %160 = vmatpush.bf16.msra.mxu0 %v423_v1  ;;  %v90_v14 = vpack.c.bf16 %v89_v13, %v88_v12  ;;  %v428_v15 = vld [vmem:[#allocation8 + $0x18] sm:$0xff]  ;;  %v427_v16 = vld [vmem:[#allocation8 + $0x10] sm:$0xff]  ;;  %v426_v17 = vld [vmem:[#allocation8 + $0x8] sm:$0xff] }
  0x15   :  { %243 = vmatpush.bf16.msra.mxu1 %v431_v3  ;;  %v425_v18 = vld [vmem:[#allocation8] sm:$0xff]  ;;  %v441_v20 = vld [vmem:[%s635_s2] ss:$0 sm:$0xff] }
  0x16   :  { %v442_v27 = vld [vmem:[%s637_s4] ss:$0 sm:$0xff] }
  0x17   :  { %v84_v28 = vadd.f32 %v442_v27, %v88_v12  ;;  %v85_v31 = vadd.f32 %v442_v27, %v89_v13 }
  0x18   :  { %161 = vmatpush.bf16.msra.mxu0 %v422_v4 }
  0x19   :  { %244 = vmatpush.bf16.msra.mxu1 %v430_v5 }
  0x1c   :  { %162 = vmatpush.bf16.msra.mxu0 %v421_v6 }
  0x1d   :  { %245 = vmatpush.bf16.msra.mxu1 %v429_v7 }
  0x20   :  { %163 = vmatpush.bf16.msra.mxu0 %v420_v8 }
  0x21   :  { %246 = vmatpush.bf16.msra.mxu1 %v428_v15  ;;  %v444_v15 = vld [vmem:[%s639_s6] ss:$0 sm:$0xff] }
  0x24   :  { %164 = vmatpush.bf16.msra.mxu0 %v419_v9 }
  0x25   :  { %247 = vmatpush.bf16.msra.mxu1 %v427_v16 }
  0x28   :  { %165 = vmatpush.bf16.msra.mxu0 %v418_v10 }
  0x29   :  { %248 = vmatpush.bf16.msra.mxu1 %v426_v17 }
  0x2c   :  { %166 = vmatpush.bf16.msra.mxu0 %v417_v11  ;;  %v443_v11 = vld [vmem:[%s638_s5] ss:$0 sm:$0xff] }
  0x2d   :  { %249 = vmatpush.bf16.msra.mxu1 %v425_v18 }
  0x2f   :  { %167 = vmatmul.bf16.vlgmr.msra.gmra.mxu0 %v90_v14 }
  0xac   :  { %v168_v19 = vpop.f32.mrf.mxu0 }
  0xad   :  { %v169_v21 = vadd.f32 %v441_v20, %v168_v19 }
  0xaf   :  { %v173_v24 = vmax.f32 %v169_v21, 0.0 }
  0xb4   :  { %v170_v22 = vpop.f32.mrf.mxu0 }
  0xb5   :  { %v171_v23 = vadd.f32 %v441_v20, %v170_v22 }
  0xb7   :  { %v174_v25 = vmax.f32 %v171_v23, 0.0 }
  0xb9   :  { %v177_v26 = vpack.c.bf16 %v174_v25, %v173_v24 }
  0xbb   :  { %250 = vmatmul.bf16.vlgmr.msra.gmra.mxu1 %v177_v26 }
 0x138   :  { %v251_v29 = vpop.f32.mrf.mxu1 }
 0x139   :  { %v256_v30 = vadd.f32 %v251_v29, %v84_v28 }
 0x13b   :  { %265 = vadd.xlane.f32.xlu0 %v256_v30 }
 0x140   :  { %v253_v32 = vpop.f32.mrf.mxu1 }
 0x141   :  { %v257_v33 = vadd.f32 %v253_v32, %v85_v31 }
 0x143   :  { %267 = vadd.xlane.f32.xlu0 %v257_v33 }
 0x1ae   :  { %v266_v34 = vpop.xlane.xlu0 %265 }
 0x1af   :  { %v269_v35 = vmul.f32 0.03125, %v266_v34 }
 0x1b1   :  { %v271_v36 = vsub.f32 %v256_v30, %v269_v35  ;;  %v279_v42 = vmul.f32 %v269_v35, %v269_v35 }
 0x1b3   :  { %v273_v37 = vmul.f32 %v271_v36, %v271_v36  ;;  %v281_v43 = vmul.f32 96.0, %v279_v42 }
 0x1b5   :  { %275 = vadd.xlane.f32.xlu1 %v273_v37 }
 0x1b6   :  { %v268_v38 = vpop.xlane.xlu0 %267 }
 0x1b7   :  { %v270_v39 = vmul.f32 0.03125, %v268_v38 }
 0x1b9   :  { %v272_v40 = vsub.f32 %v257_v33, %v270_v39  ;;  %v280_v46 = vmul.f32 %v270_v39, %v270_v39 }
 0x1bb   :  { %v274_v41 = vmul.f32 %v272_v40, %v272_v40  ;;  %v282_v49 = vmul.f32 96.0, %v280_v46 }
 0x1bd   :  { %277 = vadd.xlane.f32.xlu1 %v274_v41 }
 0x228   :  { %v276_v44 = vpop.xlane.xlu1 %275 }
 0x229   :  { %v283_v45 = vsub.f32 %v276_v44, %v281_v43 }
 0x22b   :  { %v285_v47 = vmax.f32 %v283_v45, 0.0 }
 0x22d   :  { %v287_v48 = vmul.f32 0.032258064, %v285_v47 }
 0x22f   :  { %445 = vrsqrt.f32 %v287_v48  ;;  %vm296_vm0 = vcmp.eq.f32.partialorder %v287_v48, inf  ;;  %v299_v0 = vand.u32 2147483648, %v287_v48  ;;  %vm298_vm1 = vcmp.eq.f32.partialorder %v287_v48, 0.0 }
 0x230   :  { %v278_v50 = vpop.xlane.xlu1 %277 }
 0x231   :  { %v284_v51 = vsub.f32 %v278_v50, %v282_v49 }
 0x233   :  { %v286_v52 = vmax.f32 %v284_v51, 0.0 }
 0x235   :  { %v446_v53 = vpop.eup %445  ;;  %v288_v54 = vmul.f32 0.032258064, %v286_v52 }
 0x236   :  { %v290_v55 = vmul.f32 %v446_v53, %v287_v48 }
 0x237   :  { %447 = vrsqrt.f32 %v288_v54  ;;  %vm308_vm2 = vcmp.eq.f32.partialorder %v288_v54, inf  ;;  %v311_v8 = vand.u32 2147483648, %v288_v54  ;;  %vm310_vm3 = vcmp.eq.f32.partialorder %v288_v54, 0.0 }
 0x238   :  { %v291_v56 = vmul.f32 %v446_v53, %v290_v55 }
 0x23a   :  { %v292_v57 = vmul.f32 0.5, %v291_v56 }
 0x23c   :  { %v293_v58 = vsub.f32 1.5, %v292_v57 }
 0x23d   :  { %v448_v59 = vpop.eup %447 }
 0x23e   :  { %v294_v60 = vmul.f32 %v446_v53, %v293_v58  ;;  %v302_v61 = vmul.f32 %v448_v59, %v288_v54 }
 0x240   :  { %v295_v62 = vmul.f32 %v294_v60, %v287_v48  ;;  %v303_v63 = vmul.f32 %v448_v59, %v302_v61 }
 0x242   :  { %v304_v1 = vmul.f32 0.5, %v303_v63  ;;  %v297_v2 = vsel %vm296_vm0, %v287_v48, %v295_v62 }
 0x243   :  { %v300_v3 = vsel %vm298_vm1, %v299_v0, %v297_v2 }
 0x244   :  { %v305_v4 = vsub.f32 1.5, %v304_v1  ;;  %v313_v5 = vadd.f32 0.001, %v300_v3 }
 0x246   :  { %v306_v6 = vmul.f32 %v448_v59, %v305_v4  ;;  %449 = vrcp.f32 %v313_v5 }
 0x248   :  { %v307_v7 = vmul.f32 %v306_v6, %v288_v54 }
 0x24a   :  { %v309_v9 = vsel %vm308_vm2, %v288_v54, %v307_v7 }
 0x24b   :  { %v312_v10 = vsel %vm310_vm3, %v311_v8, %v309_v9 }
 0x24c   :  { %v450_v12 = vpop.eup %449  ;;  %v314_v13 = vadd.f32 0.001, %v312_v10 }
 0x24d   :  { %v317_v14 = vmul.f32 %v450_v12, %v271_v36 }
 0x24e   :  { %451 = vrcp.f32 %v314_v13 }
 0x24f   :  { %v323_v16 = vmul.f32 %v443_v11, %v317_v14 }
 0x251   :  { %v329_v17 = vadd.f32 %v444_v15, %v323_v16 }
 0x253   :  { %331 = vst [vmem:[#allocation9] sm:$0xff] %v329_v17 }
 0x254   :  { %v452_v18 = vpop.eup %451 }
 0x255   :  { %v318_v19 = vmul.f32 %v452_v18, %v272_v40 }
 0x257   :  { %v324_v20 = vmul.f32 %v443_v11, %v318_v19 }
 0x259   :  { %v330_v21 = vadd.f32 %v444_v15, %v324_v20 }
 0x25b   :  { %332 = vst [vmem:[#allocation9 + $0x8] sm:$0xff] %v330_v21 }
 0x25c   :  { %345 = dma.vmem_to_hbm [thread:$0]  %s338_s24, 256, %s340_s27, [#allocation5], %s559_s13, %s559_s13, %s560_s14  }
 0x25d   :  { %553 = dma.done.wait [#allocation5], 256  }
 0x25e   :  { %554 = vsyncadd [#allocation5], 4294967040 }
 0x25f   :  { %350 = vsyncpa [#allocation4], 1 }
 0x260   :  { %351 = vsyncpa [#allocation7], 1 }
 0x261   :  { %352 = vsyncpa [#allocation5], 1 }

</bundles_post_ra>
